<compile_context>
chip_gen: v7x
topology: tpu7x:2x2x1
jax: 0.10.0
libtpu: 0.0.40
codegen_flags: <defaults>
</compile_context>

<pallas_src>
import functools

import jax
import jax.numpy as jnp
from jax.experimental import pallas as pl
from jax.experimental.pallas import tpu as pltpu

# Layer sizes of the MLP (in -> out).
LAYER_SIZES = [2, 20, 30, 30, 20, 20, 1]

# ---- packed parameter slab layout (rows x cols, f32) ------------------------
#   rows   0: 20   W1 (20, 2)  at cols 0:2    b1 at col 30
#   rows  20: 50   W2 (30,20)  at cols 0:20   b2 at col 30
#   rows  50: 80   W3 (30,30)  at cols 0:30   b3 at col 30
#   rows  80:100   W4 (20,30)  at cols 0:30   b4 at col 30
#   rows 100:120   W5 (20,20)  at cols 0:20   b5 at col 30
#   rows 120:140   W6^T (20,1) at col  0      b6 at [120, 30]
_SLAB_ROWS, _SLAB_COLS = 144, 32
_BIAS_COL = 30

# Default cap on lanes per grid step (review: 4096-8192 amortizes per-step
# overhead while staying inside v5e's 16 MiB scoped-VMEM default).
TILE_MAX = 8192


def _round_up(n, m):
    return (n + m - 1) // m * m


@functools.lru_cache(maxsize=1)
def _grid_semantics():
    """v7x has 2 TensorCores: shard the lane-tile grid axis across them."""
    try:
        kind = jax.devices()[0].device_kind.lower()
    except Exception:  # pragma: no cover
        kind = ""
    core_parallel = getattr(pltpu, "CORE_PARALLEL", None)
    if "v7" in kind and core_parallel is not None:
        return (core_parallel,), True
    return ("parallel",), False


def _pack_params(params):
    """Pack all six layers' weights/biases into one (144, 32) f32 slab."""
    assert len(params) == len(LAYER_SIZES) - 1
    slab = jnp.zeros((_SLAB_ROWS, _SLAB_COLS), jnp.float32)
    offs = (0, 20, 50, 80, 100)
    for li in range(5):
        w, b = params[li]
        w = jnp.asarray(w, jnp.float32)
        b = jnp.asarray(b, jnp.float32)
        o = offs[li]
        out_d, in_d = w.shape
        slab = slab.at[o:o + out_d, :in_d].set(w)
        slab = slab.at[o:o + out_d, _BIAS_COL].set(b)
    w6, b6 = params[5]                                       # (1,20), (1,)
    slab = slab.at[120:140, 0].set(jnp.asarray(w6, jnp.float32).reshape(20))
    slab = slab.at[120, _BIAS_COL].set(jnp.asarray(b6, jnp.float32).reshape(()))
    return slab


def _mlp_kernel(x_ref, p_ref, o_ref, *, act_dtype):
    """Fused 6-layer MLP. Batch on lanes: x (2,Tn), activations (feat,Tn), out (1,Tn)."""
    f32 = jnp.float32
    x = x_ref[...]                                           # (2, Tn) f32

    def act(v):
        # act_dtype=bf16 (v6e/v7x only) halves the EUP tanh vreg count.
        return jnp.tanh(v if act_dtype == f32 else v.astype(act_dtype))

    def dense(h, r0, r1, in_d):
        # MXU matmul, f32 accumulation; weight dtype matches h (f32 by default).
        w = p_ref[r0:r1, 0:in_d]
        b = p_ref[r0:r1, _BIAS_COL:_BIAS_COL + 1]
        return jnp.dot(w.astype(h.dtype), h, preferred_element_type=f32) + b

    # Layer 1 (K=2): VPU broadcast-FMA, no padded MXU matmul.
    w1 = p_ref[0:20, 0:2]                                    # (20, 2)
    b1 = p_ref[0:20, _BIAS_COL:_BIAS_COL + 1]                # (20, 1)
    h = act(w1[:, 0:1] * x[0:1, :] + w1[:, 1:2] * x[1:2, :] + b1)   # (20, Tn)

    # Layers 2-5: lane-dense MXU matmuls.
    h = act(dense(h, 20, 50, 20))                            # (30, Tn)
    h = act(dense(h, 50, 80, 30))                            # (30, Tn)
    h = act(dense(h, 80, 100, 30))                           # (20, Tn)
    h = act(dense(h, 100, 120, 20))                          # (20, Tn)

    # Layer 6 (out=1): VPU multiply + sublane reduce (XLU) instead of M=1 matmul.
    w6 = p_ref[120:140, 0:1]                                 # (20, 1)
    b6 = p_ref[120:121, _BIAS_COL:_BIAS_COL + 1]             # (1, 1)
    out = jnp.sum(w6 * h.astype(f32), axis=0, keepdims=True) + b6   # (1, Tn)
    o_ref[...] = out.astype(o_ref.dtype)


@functools.partial(jax.jit, static_argnames=("tile_n", "act_dtype"))
def nn_forward(x, params, *, tile_n=None, act_dtype="float32"):
    """Runs the fused MLP Pallas kernel.

    x:       (N, 2) float32 — same convention as the PyTorch module.
    params:  list of (W, b) in torch convention: W (out, in), b (out,).
    tile_n:  lanes per grid step (multiple of 128). None -> adaptive:
             min(TILE_MAX, round_up(N, 128)).
    act_dtype: "float32" (exact, default) or "bfloat16" (faster tanh on
             v6e/v7x, ~1e-3 rel error; do NOT use on v5e).
    """
    N, in_dim = x.shape
    assert in_dim == LAYER_SIZES[0]
    assert len(params) == len(LAYER_SIZES) - 1

    if tile_n is None:
        tile_n = min(TILE_MAX, _round_up(max(N, 1), 128))
    assert tile_n % 128 == 0

    dims, core_parallel = _grid_semantics()

    # Batch on lanes: (N, 2) -> (2, N), padded to a whole number of tiles
    # (an even number of tiles when sharding across v7x's two TensorCores).
    n_pad = _round_up(N, tile_n)
    if core_parallel:
        n_pad = _round_up(n_pad, 2 * tile_n)
    x_t = x.astype(jnp.float32).T                            # (2, N)
    if n_pad != N:
        x_t = jnp.pad(x_t, ((0, 0), (0, n_pad - N)))

    grid = (n_pad // tile_n,)
    slab = _pack_params(params)

    # Scoped-VMEM headroom only matters for very large explicit tiles; the
    # default 8192 cap stays well inside v5e's 16 MiB scoped default.
    vmem_limit = None
    if tile_n > 8192:
        vmem_limit = min(60 << 20, 512 * tile_n + (4 << 20))

    cost = pl.CostEstimate(
        flops=5120 * n_pad,              # 2 * sum(in*out) per sample
        transcendentals=120 * n_pad,     # total tanh width per sample
        bytes_accessed=12 * n_pad + slab.size * 4,
    )

    kernel = functools.partial(_mlp_kernel, act_dtype=jnp.dtype(act_dtype))

    out_t = pl.pallas_call(
        kernel,
        out_shape=jax.ShapeDtypeStruct((1, n_pad), jnp.float32),
        grid_spec=pl.GridSpec(
            grid=grid,
            in_specs=[
                pl.BlockSpec((in_dim, tile_n), lambda i: (0, i)),
                # Whole param slab, constant index -> DMA'd once, VMEM-resident.
                pl.BlockSpec((_SLAB_ROWS, _SLAB_COLS), lambda i: (0, 0)),
            ],
            out_specs=pl.BlockSpec((1, tile_n), lambda i: (0, i)),
        ),
        compiler_params=pltpu.CompilerParams(
            dimension_semantics=dims,
            vmem_limit_bytes=vmem_limit),
        cost_estimate=cost,
    )(x_t, slab)

    # Back to torch convention: (N, 1).
    return out_t[:, :N].T


def init_params(key):
    """Deterministic init mimicking torch.nn.Linear default (+/- 1/sqrt(fan_in)).

    Returns params in torch convention: W (out, in), b (out,).
    """
    params = []
    for fan_in, fan_out in zip(LAYER_SIZES[:-1], LAYER_SIZES[1:]):
        key, kw, kb = jax.random.split(key, 3)
        bound = 1.0 / jnp.sqrt(float(fan_in))
        w = jax.random.uniform(kw, (fan_out, fan_in), jnp.float32, -bound, bound)
        b = jax.random.uniform(kb, (fan_out,), jnp.float32, -bound, bound)
        params.append((w, b))
    return params


def nn_forward_ref(x, params):
    """Pure-JAX reference of the same forward pass (torch convention)."""
    h = x.astype(jnp.float32)
    for i, (w, b) in enumerate(params):
        h = h @ w.T + b
        if i < len(params) - 1:
            h = jnp.tanh(h)
    return h


if __name__ == "__main__":
    key = jax.random.PRNGKey(0)
    kp, kx = jax.random.split(key)
    params = init_params(kp)

    # Small latency-style batch: adaptive tiling -> a single 128-lane tile.
    N_small = 64
    x_small = jax.random.normal(kx, (N_small, 2), dtype=jnp.float32)
    out_small = jax.block_until_ready(nn_forward(x_small, params))
    ref_small = nn_forward_ref(x_small, params)
    assert out_small.shape == (N_small, 1)
    assert jnp.allclose(out_small, ref_small, atol=1e-5, rtol=1e-5), \
        "small-batch mismatch vs reference"

    # Larger batch exercising the multi-tile grid path (tile_n = 8192).
    N_big = 10000
    x_big = jax.random.normal(jax.random.PRNGKey(1), (N_big, 2), dtype=jnp.float32)
    out_big = jax.block_until_ready(nn_forward(x_big, params))
    ref_big = nn_forward_ref(x_big, params)
    assert out_big.shape == (N_big, 1)
    assert jnp.allclose(out_big, ref_big, atol=1e-5, rtol=1e-5), \
        "large-batch mismatch vs reference"

    print("KERNEL_OK")
</pallas_src>

<mosaic_0001>
module attributes {stable_mosaic.version = 11 : i64} {
  func.func @_mlp_kernel(%arg0: i32, %arg1: memref<2x128xf32, #tpu.memory_space<vmem>>, %arg2: memref<144x32xf32, #tpu.memory_space<vmem>>, %arg3: memref<1x128xf32, #tpu.memory_space<vmem>>) attributes {dimension_semantics = [#tpu.dimension_semantics<parallel>], iteration_bounds = array<i64: 1>, scalar_prefetch = 0 : i64, scratch_operands = 0 : i64, tpu.core_type = #tpu.core_type<tc>, window_params = [{transform_indices = @transform_0, window_bounds = array<i64: 2, 128>}, {pipeline_mode = #tpu.pipeline_mode<synchronous>, transform_indices = @transform_1, window_bounds = array<i64: 144, 32>}, {transform_indices = @transform_2, window_bounds = array<i64: 1, 128>}]} {
    %c0 = arith.constant 0 : index
    %c0_0 = arith.constant 0 : index
    %0 = vector.load %arg1[%c0, %c0_0] : memref<2x128xf32, #tpu.memory_space<vmem>>, vector<2x128xf32>
    %c0_1 = arith.constant 0 : index
    %c0_2 = arith.constant 0 : index
    %1 = vector.load %arg2[%c0_1, %c0_2] : memref<144x32xf32, #tpu.memory_space<vmem>>, vector<20x2xf32>
    %c0_3 = arith.constant 0 : index
    %c30 = arith.constant 30 : index
    %2 = vector.load %arg2[%c0_3, %c30] : memref<144x32xf32, #tpu.memory_space<vmem>>, vector<20x1xf32>
    %3 = vector.extract_strided_slice %1 {offsets = [0, 0], sizes = [20, 1], strides = [1, 1]} : vector<20x2xf32> to vector<20x1xf32>
    %4 = vector.extract_strided_slice %0 {offsets = [0, 0], sizes = [1, 128], strides = [1, 1]} : vector<2x128xf32> to vector<1x128xf32>
    %5 = vector.broadcast %3 : vector<20x1xf32> to vector<20x128xf32>
    %6 = vector.broadcast %4 : vector<1x128xf32> to vector<20x128xf32>
    %7 = arith.mulf %5, %6 : vector<20x128xf32>
    %8 = vector.extract_strided_slice %1 {offsets = [0, 1], sizes = [20, 1], strides = [1, 1]} : vector<20x2xf32> to vector<20x1xf32>
    %9 = vector.extract_strided_slice %0 {offsets = [1, 0], sizes = [1, 128], strides = [1, 1]} : vector<2x128xf32> to vector<1x128xf32>
    %10 = vector.broadcast %8 : vector<20x1xf32> to vector<20x128xf32>
    %11 = vector.broadcast %9 : vector<1x128xf32> to vector<20x128xf32>
    %12 = arith.mulf %10, %11 : vector<20x128xf32>
    %13 = arith.addf %7, %12 : vector<20x128xf32>
    %14 = vector.broadcast %2 : vector<20x1xf32> to vector<20x128xf32>
    %15 = arith.addf %13, %14 : vector<20x128xf32>
    %16 = math.tanh %15 : vector<20x128xf32>
    %c20 = arith.constant 20 : index
    %c0_4 = arith.constant 0 : index
    %17 = vector.load %arg2[%c20, %c0_4] : memref<144x32xf32, #tpu.memory_space<vmem>>, vector<30x20xf32>
    %c20_5 = arith.constant 20 : index
    %c30_6 = arith.constant 30 : index
    %18 = vector.load %arg2[%c20_5, %c30_6] : memref<144x32xf32, #tpu.memory_space<vmem>>, vector<30x1xf32>
    %cst = arith.constant dense<0.000000e+00> : vector<30x128xf32>
    %19 = tpu.matmul %17, %16, %cst {dimension_numbers = #tpu.dot_dimension_numbers<[1], [0], [0], [1], [0, 0, 1, 1], [], []>} : vector<30x20xf32>, vector<20x128xf32>, vector<30x128xf32> -> vector<30x128xf32>
    %20 = vector.broadcast %18 : vector<30x1xf32> to vector<30x128xf32>
    %21 = arith.addf %19, %20 : vector<30x128xf32>
    %22 = math.tanh %21 : vector<30x128xf32>
    %c50 = arith.constant 50 : index
    %c0_7 = arith.constant 0 : index
    %23 = vector.load %arg2[%c50, %c0_7] : memref<144x32xf32, #tpu.memory_space<vmem>>, vector<30x30xf32>
    %c50_8 = arith.constant 50 : index
    %c30_9 = arith.constant 30 : index
    %24 = vector.load %arg2[%c50_8, %c30_9] : memref<144x32xf32, #tpu.memory_space<vmem>>, vector<30x1xf32>
    %cst_10 = arith.constant dense<0.000000e+00> : vector<30x128xf32>
    %25 = tpu.matmul %23, %22, %cst_10 {dimension_numbers = #tpu.dot_dimension_numbers<[1], [0], [0], [1], [0, 0, 1, 1], [], []>} : vector<30x30xf32>, vector<30x128xf32>, vector<30x128xf32> -> vector<30x128xf32>
    %26 = vector.broadcast %24 : vector<30x1xf32> to vector<30x128xf32>
    %27 = arith.addf %25, %26 : vector<30x128xf32>
    %28 = math.tanh %27 : vector<30x128xf32>
    %c80 = arith.constant 80 : index
    %c0_11 = arith.constant 0 : index
    %29 = vector.load %arg2[%c80, %c0_11] : memref<144x32xf32, #tpu.memory_space<vmem>>, vector<20x30xf32>
    %c80_12 = arith.constant 80 : index
    %c30_13 = arith.constant 30 : index
    %30 = vector.load %arg2[%c80_12, %c30_13] : memref<144x32xf32, #tpu.memory_space<vmem>>, vector<20x1xf32>
    %cst_14 = arith.constant dense<0.000000e+00> : vector<20x128xf32>
    %31 = tpu.matmul %29, %28, %cst_14 {dimension_numbers = #tpu.dot_dimension_numbers<[1], [0], [0], [1], [0, 0, 1, 1], [], []>} : vector<20x30xf32>, vector<30x128xf32>, vector<20x128xf32> -> vector<20x128xf32>
    %32 = vector.broadcast %30 : vector<20x1xf32> to vector<20x128xf32>
    %33 = arith.addf %31, %32 : vector<20x128xf32>
    %34 = math.tanh %33 : vector<20x128xf32>
    %c100 = arith.constant 100 : index
    %c0_15 = arith.constant 0 : index
    %35 = vector.load %arg2[%c100, %c0_15] : memref<144x32xf32, #tpu.memory_space<vmem>>, vector<20x20xf32>
    %c100_16 = arith.constant 100 : index
    %c30_17 = arith.constant 30 : index
    %36 = vector.load %arg2[%c100_16, %c30_17] : memref<144x32xf32, #tpu.memory_space<vmem>>, vector<20x1xf32>
    %cst_18 = arith.constant dense<0.000000e+00> : vector<20x128xf32>
    %37 = tpu.matmul %35, %34, %cst_18 {dimension_numbers = #tpu.dot_dimension_numbers<[1], [0], [0], [1], [0, 0, 1, 1], [], []>} : vector<20x20xf32>, vector<20x128xf32>, vector<20x128xf32> -> vector<20x128xf32>
    %38 = vector.broadcast %36 : vector<20x1xf32> to vector<20x128xf32>
    %39 = arith.addf %37, %38 : vector<20x128xf32>
    %40 = math.tanh %39 : vector<20x128xf32>
    %c120 = arith.constant 120 : index
    %c0_19 = arith.constant 0 : index
    %41 = vector.load %arg2[%c120, %c0_19] : memref<144x32xf32, #tpu.memory_space<vmem>>, vector<20x1xf32>
    %c120_20 = arith.constant 120 : index
    %c30_21 = arith.constant 30 : index
    %42 = vector.load %arg2[%c120_20, %c30_21] : memref<144x32xf32, #tpu.memory_space<vmem>>, vector<1x1xf32>
    %43 = vector.broadcast %41 : vector<20x1xf32> to vector<20x128xf32>
    %44 = arith.mulf %43, %40 : vector<20x128xf32>
    %cst_22 = arith.constant dense<0.000000e+00> : vector<128xf32>
    %45 = vector.multi_reduction <add>, %44, %cst_22 [0] : vector<20x128xf32> to vector<128xf32>
    %46 = vector.shape_cast %45 : vector<128xf32> to vector<1x128xf32>
    %47 = vector.broadcast %42 : vector<1x1xf32> to vector<1x128xf32>
    %48 = arith.addf %46, %47 : vector<1x128xf32>
    %c0_23 = arith.constant 0 : index
    %c0_24 = arith.constant 0 : index
    %49 = vector.load %arg3[%c0_23, %c0_24] : memref<1x128xf32, #tpu.memory_space<vmem>>, vector<1x128xf32>
    tpu.vector_store %arg3[%c0_23, %c0_24], %48 {strides = array<i32>} : memref<1x128xf32, #tpu.memory_space<vmem>>, vector<1x128xf32>,
    return
  }
  func.func @transform_0(%arg0: i32) -> (i32, i32) {
    %c0_i32 = arith.constant 0 : i32
    %c0_i32_0 = arith.constant 0 : i32
    return %c0_i32, %arg0 : i32, i32
  }
  func.func @transform_1(%arg0: i32) -> (i32, i32) {
    %c0_i32 = arith.constant 0 : i32
    %c0_i32_0 = arith.constant 0 : i32
    %c0_i32_1 = arith.constant 0 : i32
    return %c0_i32, %c0_i32_0 : i32, i32
  }
  func.func @transform_2(%arg0: i32) -> (i32, i32) {
    %c0_i32 = arith.constant 0 : i32
    %c0_i32_0 = arith.constant 0 : i32
    return %c0_i32, %arg0 : i32, i32
  }
}

</mosaic_0001>

<bundles_post_ra>
// kernel: nn_forward.1
= control target key start
LH: loop header
LB: loop body
LE: loop exit
PB: predicated region body
PF: predicated region fallthrough
CT: control target
= control target key end

     0   :  { %v771_v0 = vmov 1   ;;  %v772_v1 = vmov 0   ;;  %v773_v4 = vmov 30   ;;  %vm101_vm0 = vcmask 162816   ;;  %s956_s1 = inlined_call_operand.vmem [shape: f32[144,32], index: 1, kind: input, shape index: {}]   ;;  %s957_s0 = inlined_call_operand.vmem [shape: f32[2,128], index: 0, kind: input, shape index: {}]   ;;  %s958_s2 = inlined_call_operand.vmem [shape: f32[1,128], index: 2, kind: output, shape index: {}]  }
   0x1   :  { %727 = vset.pattern.permute.xlu1 %v771_v0  ;;  %726 = vset.pattern.permute.xlu0 %v772_v1  ;;  %v12_v2 = vld [vmem:[%s956_s1] sm:$0xff]  ;;  %v13_v3 = vld [vmem:[%s956_s1 + $0x8] sm:$0xff]  ;;  %v14_v5 = vld [vmem:[%s956_s1 + $0x10] sm:$0xf]  ;;  %v30_v20 = vlaneseq  ;;  %vm110_vm1 = vcmask 1043456   ;;  %vm227_vm2 = vcmask 244736  }
   0x2   :  { %38 = vperm.xlu1 %727, %v12_v2   ;;  %17 = vperm.xlu0 %726, %v12_v2   ;;  %v77_v6 = vld [vmem:[%s956_s1 + $0x14] sm:$0xff]  ;;  %v812_v7 = vld [vmem:[%s956_s1 + $0x24] sm:$0xff]  ;;  %v818_v8 = vld [vmem:[%s956_s1 + $0x2c] sm:$0x3f]  ;;  %vm236_vm3 = vcmask 1045504   ;;  %vm774_vm4 = vmmov 1  }
   0x3   :  { %v824_v9 = vld [vmem:[%s956_s1 + $0x3a] sm:$0xff]  ;;  %643 = vmatprep.mubr.msk.f32.mxu0 %vm101_vm0, %v77_v6  ;;  %v837_v11 = vld [vmem:[%s956_s1 + $0x4a] sm:$0x3f]  ;;  %v855_v14 = vld [vmem:[%s956_s1 + $0x74] sm:$0xf]  ;;  %v31_v21 = vshrl.u32 %v30_v20, 7 }
   0x4   :  { %v830_v10 = vld [vmem:[%s956_s1 + $0x1c] sm:$0xff]  ;;  %v849_v13 = vld [vmem:[%s956_s1 + $0x64] sm:$0xff]  ;;  %v203_v15 = vld [vmem:[%s956_s1 + $0x32] sm:$0xff]  ;;  %vm776_vm6 = vmmov 0  }
   0x5   :  { %v843_v12 = vld [vmem:[%s956_s1 + $0x58] sm:$0xff]  ;;  %v864_v16 = vld [vmem:[%s956_s1 + $0x42] sm:$0xff]  ;;  %v870_v17 = vld [vmem:[%s956_s1 + $0x50] sm:$0xff]  ;;  %v51_v22 = vsub.s32 1, %v31_v21  ;;  %v32_v23 = vsub.s32 0, %v31_v21  ;;  %657 = vmatprep.mubr.msk.f32.mxu1 %vm227_vm2, %v203_v15 }
   0x6   :  { %42 = vperm.xlu1 %727, %v13_v3   ;;  %22 = vperm.xlu0 %726, %v13_v3   ;;  %v876_v18 = vld [vmem:[%s956_s1 + $0x60] sm:$0xf]  ;;  %v882_v19 = vld [vmem:[%s956_s1 + $0x6c] sm:$0xff]  ;;  %vm897_vm5 = vmpackc.low %vm236_vm3, %vm774_vm4 }
   0x7   :  { %v11_v24 = vld [vmem:[%s957_s0] sm:$0x3] }
   0x8   :  { %v52_v26 = vrot.slane %v11_v24, %v51_v22  ;;  %v33_v28 = vrot.slane %v11_v24, %v32_v23 }
   0xa   :  { %729 = vset.pattern.permute.xlu1 %v773_v4  ;;  %728 = vset.pattern.permute.xlu0 %v773_v4 }
   0xb   :  { %64 = vperm.xlu1 %729, %v13_v3   ;;  %60 = vperm.xlu0 %728, %v12_v2  }
   0xf   :  { %730 = vset.pattern.permute.xlu1 %v772_v1  ;;  %731 = vset.pattern.permute.xlu0 %v771_v0 }
  0x10   :  { %27 = vperm.xlu1 %730, %v14_v5   ;;  %46 = vperm.xlu0 %731, %v14_v5  }
  0x14   :  { %732 = vset.pattern.permute.xlu1 %v773_v4  ;;  %733 = vset.pattern.permute.xlu0 %v773_v4 }
  0x15   :  { %68 = vperm.xlu1 %732, %v14_v5   ;;  %88 = vperm.xlu0 %733, %v830_v10  }
  0x19   :  { %83 = vperm.xlu1 %732, %v77_v6   ;;  %209 = vperm.xlu0 %733, %v203_v15  }
  0x1d   :  { %93 = vperm.xlu1 %732, %v812_v7   ;;  %219 = vperm.xlu0 %733, %v864_v16  }
  0x21   :  { %98 = vperm.xlu1 %732, %v818_v8   ;;  %334 = vperm.xlu0 %733, %v870_v17  }
  0x25   :  { %214 = vperm.xlu1 %732, %v824_v9   ;;  %344 = vperm.xlu0 %733, %v876_v18  }
  0x29   :  { %224 = vperm.xlu1 %732, %v837_v11   ;;  %449 = vperm.xlu0 %733, %v882_v19  }
  0x2d   :  { %339 = vperm.xlu1 %732, %v843_v12   ;;  %734 = vset.pattern.permute.xlu0 %v772_v1 }
  0x31   :  { %444 = vperm.xlu1 %732, %v849_v13  }
  0x35   :  { %454 = vperm.xlu1 %732, %v855_v14  }
  0x39   :  { %735 = vset.pattern.permute.xlu1 %v772_v1 }
  0x81   :  { %v39_v25 = vpop.permute.xlu1 %38  ;;  %v18_v27 = vpop.permute.xlu0 %17 }
  0x82   :  { %v53_v29 = vmul.f32 %v52_v26, %v39_v25  ;;  %v34_v30 = vmul.f32 %v33_v28, %v18_v27 }
  0x84   :  { %v56_v36 = vadd.f32 %v53_v29, %v34_v30 }
  0x85   :  { %v43_v31 = vpop.permute.xlu1 %42  ;;  %v23_v32 = vpop.permute.xlu0 %22 }
  0x86   :  { %v54_v33 = vmul.f32 %v52_v26, %v43_v31  ;;  %v35_v34 = vmul.f32 %v33_v28, %v23_v32 }
  0x88   :  { %v57_v35 = vadd.f32 %v54_v33, %v35_v34  ;;  %v549_v34 = vld [vmem:[%s956_s1 + $0x78] sm:$0xff] }
  0x89   :  { %555 = vperm.xlu0 %734, %v549_v34  }
  0x8a   :  { %v65_v37 = vpop.permute.xlu1 %64  ;;  %v61_v38 = vpop.permute.xlu0 %60 }
  0x8b   :  { %v72_v39 = vadd.f32 %v65_v37, %v57_v35  ;;  %v71_v40 = vadd.f32 %v61_v38, %v56_v36  ;;  %v552_v35 = vld [vmem:[%s956_s1 + $0x78] sm:$0x1] }
  0x8d   :  { %737 = vtanh.f32 %v72_v39  ;;  %736 = vset.pattern.permute.xlu0 %v773_v4 }
  0x8e   :  { %739 = vtanh.f32 %v71_v40  ;;  %582 = vperm.xlu0 %736, %v552_v35  }
  0x8f   :  { %v28_v41 = vpop.permute.xlu1 %27  ;;  %v47_v42 = vpop.permute.xlu0 %46 }
  0x90   :  { %v36_v43 = vmul.f32 %v33_v28, %v28_v41  ;;  %v55_v44 = vmul.f32 %v52_v26, %v47_v42 }
  0x92   :  { %v58_v45 = vadd.f32 %v55_v44, %v36_v43 }
  0x94   :  { %v69_v46 = vpop.permute.xlu1 %68  ;;  %v89_v54 = vpop.permute.xlu0 %88 }
  0x95   :  { %v73_v47 = vadd.f32 %v69_v46, %v58_v45 }
  0x97   :  { %v738_v48 = vpop.eup %737  ;;  %741 = vtanh.f32 %v73_v47 }
  0x98   :  { %v740_v49 = vpop.eup %739  ;;  %v84_v52 = vpop.permute.xlu1 %83 }
  0x99   :  { %v695_v50 = vpack.c.bf16 %v738_v48, %v740_v49  ;;  %v210_v20 = vpop.permute.xlu0 %209 }
  0x9b   :  { %696 = vmatprep.subr.bf16.mxu0 %v695_v50 }
  0x9c   :  { %698 = vmatpush3.bf16.msra.mxu0 %v695_v50  ;;  %v94_v53 = vpop.permute.xlu1 %93 }
  0x9d   :  { %v220_v24 = vpop.permute.xlu0 %219 }
  0xa0   :  { %v99_v59 = vpop.permute.xlu1 %98 }
  0xa1   :  { %v742_v51 = vpop.eup %741  ;;  %v335_v36 = vpop.permute.xlu0 %334 }
  0xa2   :  { %641 = vmatprep.subr.msk.mxu0 %vm110_vm1, %v742_v51 }
  0xa3   :  { %642 = vmatpush3.msk.msra.mxu0 %vm110_vm1, %v742_v51 }
  0xa4   :  { %644 = vmatmul.mubr.msk.f32.vlgmr.msra.gmra.mrb[0].mxu0 %vm101_vm0, %v830_v10  ;;  %v777_v10 = vmov 0.0   ;;  %v215_v15 = vpop.permute.xlu1 %214 }
  0xa5   :  { %646 = vmatprep.mubr.msk.f32.mxu0 %vm101_vm0, %v812_v7  ;;  %v345_v43 = vpop.permute.xlu0 %344 }
  0xa8   :  { %647 = vmatmul.mubr.msk.f32.gmra.mrb[2].mxu0 %vm101_vm0, %v818_v8  ;;  %v775_v8 = vmov 0.0|0.0   ;;  %v225_v23 = vpop.permute.xlu1 %224 }
  0xa9   :  { %709 = vmatprep.subr.bf16.mxu0 %v775_v8  ;;  %671 = vmatprep.mubr.msk.f32.mxu0 %vm776_vm6, %v777_v10 }
  0xac   :  { %v340_v39 = vpop.permute.xlu1 %339 }
  0xb0   :  { %v445_v50 = vpop.permute.xlu1 %444 }
 0x177   :  { %v645_v55 = vpop.f32.mrb[0].mxu0 }
 0x178   :  { %v186_v56 = vadd.f32 %v645_v55, %v89_v54  ;;  %v180_v57 = vpop.f32.mrb[1].mxu0  ;;  %v450_v54 = vpop.permute.xlu0 %449 }
 0x179   :  { %v181_v58 = vadd.f32 %v180_v57, %v84_v52  ;;  %v455_v57 = vpop.permute.xlu1 %454 }
 0x17a   :  { %743 = vtanh.f32 %v186_v56 }
 0x17b   :  { %745 = vtanh.f32 %v181_v58  ;;  %v648_v60 = vpop.f32.mrb[2].mxu0 }
 0x17c   :  { %v196_v61 = vadd.f32 %v648_v60, %v99_v59  ;;  %v190_v62 = vpop.f32.mrb[3].mxu0 }
 0x17d   :  { %v191_v63 = vadd.f32 %v190_v62, %v94_v53 }
 0x17e   :  { %747 = vtanh.f32 %v196_v61  ;;  %v556_v61 = vpop.permute.xlu0 %555 }
 0x17f   :  { %749 = vtanh.f32 %v191_v63 }
 0x184   :  { %v744_v0 = vpop.eup %743 }
 0x185   :  { %v746_v1 = vpop.eup %745 }
 0x186   :  { %v699_v2 = vpack.c.bf16 %v744_v0, %v746_v1 }
 0x188   :  { %v748_v3 = vpop.eup %747  ;;  %700 = vmatprep.subr.bf16.mxu1 %v699_v2 }
 0x189   :  { %v750_v5 = vpop.eup %749  ;;  %702 = vmatpush3.bf16.msra.mxu1 %v699_v2 }
 0x18a   :  { %v703_v7 = vpack.c.bf16 %v748_v3, %v750_v5 }
 0x18c   :  { %705 = vmatprep.subr.msk.bf16.mxu1 %vm897_vm5, %v703_v7 }
 0x18d   :  { %708 = vmatpush3.bf16.msk.msra.mxu1 %vm897_vm5, %v703_v7 }
 0x18e   :  { %716 = vmatprep.subr.bf16.mxu1 %v775_v8 }
 0x190   :  { %658 = vmatmul.mubr.msk.f32.vlgmr.msra.gmra.mrb[0].mxu1 %vm227_vm2, %v824_v9 }
 0x191   :  { %660 = vmatprep.mubr.msk.f32.mxu1 %vm227_vm2, %v864_v16 }
 0x194   :  { %661 = vmatmul.mubr.msk.f32.gmra.mrb[2].mxu1 %vm227_vm2, %v837_v11 }
 0x195   :  { %686 = vmatprep.mubr.msk.f32.mxu1 %vm776_vm6, %v777_v10 }
 0x263   :  { %v659_v9 = vpop.f32.mrb[0].mxu1 }
 0x264   :  { %v312_v21 = vadd.f32 %v659_v9, %v215_v15  ;;  %v306_v22 = vpop.f32.mrb[1].mxu1 }
 0x265   :  { %v307_v16 = vadd.f32 %v306_v22, %v210_v20 }
 0x266   :  { %751 = vtanh.f32 %v312_v21  ;;  %v583_v21 = vpop.permute.xlu0 %582 }
 0x267   :  { %753 = vtanh.f32 %v307_v16  ;;  %v662_v11 = vpop.f32.mrb[2].mxu1 }
 0x268   :  { %v322_v25 = vadd.f32 %v662_v11, %v225_v23  ;;  %v316_v26 = vpop.f32.mrb[3].mxu1 }
 0x269   :  { %v317_v27 = vadd.f32 %v316_v26, %v220_v24 }
 0x26a   :  { %755 = vtanh.f32 %v322_v25 }
 0x26b   :  { %757 = vtanh.f32 %v317_v27 }
 0x270   :  { %v752_v28 = vpop.eup %751 }
 0x271   :  { %v754_v29 = vpop.eup %753 }
 0x272   :  { %v710_v30 = vpack.c.bf16 %v752_v28, %v754_v29 }
 0x274   :  { %v756_v31 = vpop.eup %755  ;;  %711 = vmatpush3.bf16.msra.mxu0 %v710_v30 }
 0x275   :  { %v758_v32 = vpop.eup %757  ;;  %712 = vmatprep.subr.bf16.mxu0 %v775_v8 }
 0x276   :  { %v713_v33 = vpack.c.bf16 %v756_v31, %v758_v32 }
 0x278   :  { %715 = vmatpush3.bf16.msk.msra.mxu0 %vm897_vm5, %v713_v33 }
 0x27b   :  { %672 = vmatmul.mubr.msk.f32.vlgmr.msra.gmra.mrb[4].mxu0 %vm227_vm2, %v870_v17  ;;  %v550_v17 = vld [vmem:[%s956_s1 + $0x80] sm:$0xff] }
 0x27c   :  { %674 = vmatprep.mubr.msk.f32.mxu0 %vm776_vm6, %v777_v10  ;;  %560 = vperm.xlu1 %735, %v550_v17  }
 0x27f   :  { %675 = vmatmul.mubr.msk.f32.gmra.mrb[6].mxu0 %vm227_vm2, %v843_v12  ;;  %v551_v12 = vld [vmem:[%s956_s1 + $0x88] sm:$0xf] }
 0x280   :  { %677 = vmatprep.mubr.msk.f32.mxu0 %vm776_vm6, %v777_v10  ;;  %565 = vperm.xlu1 %735, %v551_v12  }
 0x283   :  { %678 = vmatmul.mubr.msk.f32.gmra.mrb[8].mxu0 %vm227_vm2, %v876_v18 }
 0x2fb   :  { %v561_v62 = vpop.permute.xlu1 %560 }
 0x2ff   :  { %v566_v3 = vpop.permute.xlu1 %565 }
 0x34e   :  { %v422_v18 = vpop.f32.mrb[4].mxu0 }
 0x34f   :  { %v673_v37 = vpop.f32.mrb[5].mxu0  ;;  %v423_v38 = vadd.f32 %v422_v18, %v335_v36 }
 0x351   :  { %759 = vtanh.f32 %v423_v38 }
 0x352   :  { %v427_v40 = vpop.f32.mrb[6].mxu0 }
 0x353   :  { %v428_v41 = vadd.f32 %v427_v40, %v340_v39  ;;  %v676_v42 = vpop.f32.mrb[7].mxu0 }
 0x355   :  { %761 = vtanh.f32 %v428_v41 }
 0x356   :  { %v432_v44 = vpop.f32.mrb[8].mxu0 }
 0x357   :  { %v433_v45 = vadd.f32 %v432_v44, %v345_v43  ;;  %v679_v46 = vpop.f32.mrb[9].mxu0 }
 0x359   :  { %763 = vtanh.f32 %v433_v45 }
 0x35b   :  { %v760_v47 = vpop.eup %759 }
 0x35f   :  { %v762_v48 = vpop.eup %761 }
 0x360   :  { %v717_v49 = vpack.c.bf16 %v762_v48, %v760_v47 }
 0x362   :  { %718 = vmatpush3.bf16.msra.mxu1 %v717_v49 }
 0x363   :  { %684 = vmatprep.subr.mxu1 %v777_v10  ;;  %v764_v4 = vpop.eup %763 }
 0x366   :  { %685 = vmatpush3.msk.msra.mxu1 %vm110_vm1, %v764_v4 }
 0x367   :  { %687 = vmatmul.mubr.msk.f32.vlgmr.msra.gmra.mrb[4].mxu1 %vm101_vm0, %v849_v13 }
 0x368   :  { %689 = vmatprep.mubr.msk.f32.mxu1 %vm776_vm6, %v777_v10 }
 0x36b   :  { %690 = vmatmul.mubr.msk.f32.gmra.mrb[6].mxu1 %vm101_vm0, %v882_v19 }
 0x36c   :  { %692 = vmatprep.mubr.msk.f32.mxu1 %vm776_vm6, %v777_v10 }
 0x36f   :  { %693 = vmatmul.mubr.msk.f32.gmra.mrb[8].mxu1 %vm101_vm0, %v855_v14 }
 0x43a   :  { %v532_v51 = vpop.f32.mrb[4].mxu1 }
 0x43b   :  { %v533_v52 = vadd.f32 %v532_v51, %v445_v50  ;;  %v688_v53 = vpop.f32.mrb[5].mxu1 }
 0x43d   :  { %765 = vtanh.f32 %v533_v52 }
 0x43e   :  { %v537_v55 = vpop.f32.mrb[6].mxu1 }
 0x43f   :  { %v538_v13 = vadd.f32 %v537_v55, %v450_v54  ;;  %v691_v56 = vpop.f32.mrb[7].mxu1 }
 0x441   :  { %767 = vtanh.f32 %v538_v13 }
 0x442   :  { %v542_v58 = vpop.f32.mrb[8].mxu1 }
 0x443   :  { %v543_v59 = vadd.f32 %v542_v58, %v455_v57  ;;  %v694_v19 = vpop.f32.mrb[9].mxu1 }
 0x445   :  { %769 = vtanh.f32 %v543_v59 }
 0x447   :  { %v766_v60 = vpop.eup %765 }
 0x448   :  { %v568_v14 = vmul.f32 %v766_v60, %v556_v61 }
 0x44b   :  { %v768_v63 = vpop.eup %767 }
 0x44c   :  { %v569_v0 = vmul.f32 %v768_v63, %v561_v62 }
 0x44e   :  { %v571_v1 = vadd.f32 %v569_v0, %v568_v14 }
 0x44f   :  { %v770_v2 = vpop.eup %769 }
 0x450   :  { %v570_v5 = vmul.f32 %v770_v2, %v566_v3 }
 0x452   :  { %v572_v6 = vsel %vm110_vm1, %v570_v5, 0.0 }
 0x453   :  { %v573_v7 = vadd.f32 %v572_v6, %v571_v1 }
 0x455   :  { %v574_v8 = vrot.slane %v573_v7, 4 }
 0x457   :  { %v575_v10 = vadd.f32 %v574_v8, %v573_v7 }
 0x459   :  { %v576_v15 = vrot.slane %v575_v10, 2 }
 0x45b   :  { %v577_v20 = vadd.f32 %v576_v15, %v575_v10 }
 0x45d   :  { %v578_v9 = vrot.slane %v577_v20, 1 }
 0x45f   :  { %v579_v22 = vadd.f32 %v578_v9, %v577_v20 }
 0x461   :  { %v585_v16 = vadd.f32 %v583_v21, %v579_v22 }
 0x463   :  { %586 = vst [vmem:[%s958_s2] sm:$0x1] %v585_v16 }

</bundles_post_ra>
